<compile_context>
chip_gen: v7x
topology: tpu7x:2x2x1
jax: 0.10.0
libtpu: 0.0.40
codegen_flags: <defaults>
</compile_context>

<pallas_src>
import functools

import jax
import jax.numpy as jnp
from jax.experimental import pallas as pl
from jax.experimental.pallas import tpu as pltpu


def _round_up(x, m):
    return ((x + m - 1) // m) * m


def _stacked_lstm_kernel(x_ref, wih0_ref, w_ref, b_ref, h0_ref, c0_ref,
                         h1_ref, c1_ref, xh_ref, gx_ref):
    """One LSTM layer per grid step; inter-layer activation carried in VMEM."""
    layer = pl.program_id(0)
    H = h0_ref.shape[-1]
    B = xh_ref.shape[0]
    hp = xh_ref.shape[-1] - H          # lane-aligned x-slot width = round_up(H,128)

    @pl.when(layer == 0)
    def _():
        # Zero the x-slot once: columns H..hp stay zero for every later layer, so
        # correctness never depends on zero-padded weight rows.  Also compute the
        # layer-0 input path x @ W_ih0^T on the MXU (this block is DMA'd once).
        xh_ref[:, :hp] = jnp.zeros((B, hp), xh_ref.dtype)
        gx_ref[...] = jnp.dot(x_ref[...].astype(wih0_ref.dtype), wih0_ref[...],
                              preferred_element_type=jnp.float32)

    @pl.when(layer > 0)
    def _():
        gx_ref[...] = jnp.zeros_like(gx_ref)

    # This layer's previous hidden state goes into the h-slot of the carry.
    xh_ref[:, hp:] = h0_ref[0].astype(xh_ref.dtype)

    # Fused gate matmul: [x-slot | h] @ [W_ih^T ; W_hh^T] + b (+ layer-0 input path).
    gates = jnp.dot(xh_ref[...], w_ref[0], preferred_element_type=jnp.float32)
    gates = gates + b_ref[0].astype(jnp.float32) + gx_ref[...]

    # Gate order [i, f, o, g]: sigmoid over the first 3H, tanh over the last H
    # (5H transcendentals per row instead of 9H).
    sig = jax.nn.sigmoid(gates[:, :3 * H])
    i_g = sig[:, 0 * H:1 * H]
    f_g = sig[:, 1 * H:2 * H]
    o_g = sig[:, 2 * H:3 * H]
    g_g = jnp.tanh(gates[:, 3 * H:])

    c_prev = c0_ref[0].astype(jnp.float32)
    c_new = f_g * c_prev + i_g * g_g
    h_new = o_g * jnp.tanh(c_new)

    h1_ref[0] = h_new.astype(h1_ref.dtype)
    c1_ref[0] = c_new.astype(c1_ref.dtype)
    # Carry to the next layer: x_{l+1} = h_new (dropout is identity in eval mode).
    xh_ref[:, :H] = h_new.astype(xh_ref.dtype)


def _vmem_limit_bytes(B, Kin, k_cat, H, w_dtype, x_dtype, state_dtype, b_dtype):
    wb = jnp.dtype(w_dtype).itemsize
    xb = jnp.dtype(x_dtype).itemsize
    sb = jnp.dtype(state_dtype).itemsize
    bb = jnp.dtype(b_dtype).itemsize
    per_step = (k_cat * 4 * H * wb          # W_cat[l]
                + 4 * H * bb                # b[l]
                + 2 * B * H * sb            # h_0[l], c_0[l] in
                + 2 * B * H * sb)           # h_1[l], c_1[l] out
    resident = B * Kin * xb + Kin * 4 * H * wb   # x and W_ih0 (fetched once)
    scratch = B * k_cat * wb + B * 4 * H * 4     # [x|h] carry + layer-0 gate scratch
    total = 2 * (per_step + resident) + scratch  # double-buffered pipeline
    total = int(total * 1.25) + (2 << 20)        # margin for compiler temporaries
    # Never below the common 32 MiB default; never above v7x's 64 MiB physical VMEM.
    return max(32 * 1024 * 1024, min(total, 64 * 1024 * 1024))


def stacked_lstm_forward(w_ih0_t, w_cat, b, x, hidden,
                         dropout_rate=0.0, training=False):
    """Forward pass of StackedLSTM via a single fused Pallas call over layers.

    Args:
      w_ih0_t: (input_size, 4H)        layer-0 W_ih^T, gate columns [i, f, o, g].
      w_cat:   (L, round_up(H,128)+H, 4H) per-layer [W_ih^T (zero-padded, zeros
               for layer 0); W_hh^T], gate columns [i, f, o, g].
      b:       (L, 1, 4H)              folded b_ih + b_hh per layer.
      x:       (B, input_size)
      hidden:  (h_0, c_0), each (L, B, H)
    Returns:
      (output, (h_1, c_1)) with the same shapes/semantics as the PyTorch module.
    """
    if training and dropout_rate > 0.0:
        # TODO(synk): training-mode inter-layer dropout not implemented.
        raise NotImplementedError("training-mode dropout not implemented")

    h_0, c_0 = hidden
    num_layers, k_cat, g4 = w_cat.shape
    H = h_0.shape[-1]
    B, Kin = x.shape
    assert g4 == 4 * H
    assert w_ih0_t.shape == (Kin, 4 * H)
    assert k_cat == _round_up(H, 128) + H

    w_bytes = jnp.dtype(w_cat.dtype).itemsize
    s_bytes = jnp.dtype(h_0.dtype).itemsize
    cost = pl.CostEstimate(
        flops=2 * B * Kin * 4 * H + 2 * num_layers * B * k_cat * 4 * H,
        transcendentals=num_layers * B * 5 * H,
        bytes_accessed=(w_cat.size * w_bytes + w_ih0_t.size * w_bytes
                        + b.size * jnp.dtype(b.dtype).itemsize
                        + x.size * jnp.dtype(x.dtype).itemsize
                        + 2 * (h_0.size + c_0.size) * s_bytes),
    )
    vmem_limit = _vmem_limit_bytes(B, Kin, k_cat, H, w_cat.dtype, x.dtype,
                                   h_0.dtype, b.dtype)

    h_1, c_1 = pl.pallas_call(
        _stacked_lstm_kernel,
        out_shape=(jax.ShapeDtypeStruct(h_0.shape, h_0.dtype),
                   jax.ShapeDtypeStruct(c_0.shape, c_0.dtype)),
        grid_spec=pltpu.PrefetchScalarGridSpec(
            num_scalar_prefetch=0,
            grid=(num_layers,),
            in_specs=[
                pl.BlockSpec((B, Kin), lambda l: (0, 0)),              # x (layer 0)
                pl.BlockSpec((Kin, 4 * H), lambda l: (0, 0)),          # W_ih0^T (once)
                pl.BlockSpec((1, k_cat, 4 * H), lambda l: (l, 0, 0)),  # W_cat[l]
                pl.BlockSpec((1, 1, 4 * H), lambda l: (l, 0, 0)),      # b[l]
                pl.BlockSpec((1, B, H), lambda l: (l, 0, 0)),          # h_0[l]
                pl.BlockSpec((1, B, H), lambda l: (l, 0, 0)),          # c_0[l]
            ],
            out_specs=(
                pl.BlockSpec((1, B, H), lambda l: (l, 0, 0)),          # h_1[l]
                pl.BlockSpec((1, B, H), lambda l: (l, 0, 0)),          # c_1[l]
            ),
            scratch_shapes=[
                pltpu.VMEM((B, k_cat), w_cat.dtype),   # [x-slot | h] carry
                pltpu.VMEM((B, 4 * H), jnp.float32),   # layer-0 input-path gates
            ],
        ),
        compiler_params=pltpu.CompilerParams(
            dimension_semantics=("arbitrary",),        # layer axis carries state
            vmem_limit_bytes=vmem_limit),
        cost_estimate=cost,
        # In-place state update (true only if the caller donates h_0/c_0).
        input_output_aliases={4: 0, 5: 1},
    )(x, w_ih0_t, w_cat, b, h_0, c_0)

    # Module output = last layer's h (dropout never applies to the returned output).
    return h_1[-1], (h_1, c_1)


def init_stacked_lstm_params(key, num_layers, input_size, rnn_size,
                             weight_dtype=jnp.bfloat16, bias_dtype=jnp.float32):
    """nn.LSTMCell-style init, U(-1/sqrt(H), 1/sqrt(H)), returned pre-fused.

    Gate columns are packed as [i, f, o, g].  (To import a PyTorch checkpoint,
    transpose W_ih/W_hh and permute gate blocks from [i, f, g, o] to [i, f, o, g].)
      w_ih0_t (input_size, 4H)
      w_cat   (L, round_up(H,128)+H, 4H) = [W_ih^T zero-padded (zeros for layer 0);
                                            W_hh^T]
      b       (L, 1, 4H) = b_ih + b_hh
    """
    H = rnn_size
    hp = _round_up(H, 128)
    bound = 1.0 / float(rnn_size) ** 0.5
    w_layers, b_layers = [], []
    w_ih0_t = None
    in_sz = input_size
    for layer in range(num_layers):
        key, k1, k2, k3, k4 = jax.random.split(key, 5)
        w_ih_t = jax.random.uniform(k1, (in_sz, 4 * H), jnp.float32, -bound, bound)
        w_hh_t = jax.random.uniform(k2, (H, 4 * H), jnp.float32, -bound, bound)
        b_ih = jax.random.uniform(k3, (1, 4 * H), jnp.float32, -bound, bound)
        b_hh = jax.random.uniform(k4, (1, 4 * H), jnp.float32, -bound, bound)
        if layer == 0:
            w_ih0_t = w_ih_t                       # kept separate; x-slot rows = 0
            w_ih_pad = jnp.zeros((hp, 4 * H), jnp.float32)
        else:
            w_ih_pad = jnp.zeros((hp, 4 * H), jnp.float32).at[:H].set(w_ih_t)
        w_layers.append(jnp.concatenate([w_ih_pad, w_hh_t], axis=0))
        b_layers.append(b_ih + b_hh)
        in_sz = H
    return (w_ih0_t.astype(weight_dtype),
            jnp.stack(w_layers).astype(weight_dtype),
            jnp.stack(b_layers).astype(bias_dtype))


if __name__ == "__main__":
    num_layers = 3
    input_size = 48          # != rnn_size: exercises the separate layer-0 path
    rnn_size = 32
    batch = 8
    dropout = 0.0

    key = jax.random.PRNGKey(0)
    kp, kx, kh, kc = jax.random.split(key, 4)

    w_ih0_t, w_cat, b = init_stacked_lstm_params(kp, num_layers, input_size,
                                                 rnn_size)
    x = jax.random.normal(kx, (batch, input_size), jnp.float32)
    h_0 = jax.random.normal(kh, (num_layers, batch, rnn_size), jnp.float32)
    c_0 = jax.random.normal(kc, (num_layers, batch, rnn_size), jnp.float32)

    fwd = jax.jit(functools.partial(stacked_lstm_forward, dropout_rate=dropout))
    out, (h_1, c_1) = fwd(w_ih0_t, w_cat, b, x, (h_0, c_0))
    jax.block_until_ready((out, h_1, c_1))

    assert out.shape == (batch, rnn_size)
    assert h_1.shape == (num_layers, batch, rnn_size)
    assert c_1.shape == (num_layers, batch, rnn_size)

    # Pure-JAX reference with identical math (gate column order [i, f, o, g],
    # bf16 weights/activations into the matmul, f32 accumulation and cell state).
    def ref_forward(w_ih0_t, w_cat, b, x, hidden):
        h_0, c_0 = hidden
        H = h_0.shape[-1]
        hp = w_cat.shape[1] - H
        B = x.shape[0]
        cdt = w_cat.dtype
        gx0 = jnp.dot(x.astype(cdt), w_ih0_t, preferred_element_type=jnp.float32)
        xslot = jnp.zeros((B, hp), cdt)
        hs, cs = [], []
        for l in range(w_cat.shape[0]):
            xh = jnp.concatenate([xslot, h_0[l].astype(cdt)], axis=-1)
            g = jnp.dot(xh, w_cat[l], preferred_element_type=jnp.float32)
            g = g + b[l].astype(jnp.float32)
            if l == 0:
                g = g + gx0
            i_g = jax.nn.sigmoid(g[:, 0 * H:1 * H])
            f_g = jax.nn.sigmoid(g[:, 1 * H:2 * H])
            o_g = jax.nn.sigmoid(g[:, 2 * H:3 * H])
            g_g = jnp.tanh(g[:, 3 * H:4 * H])
            c_n = f_g * c_0[l].astype(jnp.float32) + i_g * g_g
            h_n = o_g * jnp.tanh(c_n)
            xslot = xslot.at[:, :H].set(h_n.astype(cdt))
            hs.append(h_n.astype(h_0.dtype))
            cs.append(c_n.astype(c_0.dtype))
        return hs[-1], (jnp.stack(hs), jnp.stack(cs))

    out_r, (h_r, c_r) = ref_forward(w_ih0_t, w_cat, b, x, (h_0, c_0))
    assert jnp.allclose(out, out_r, atol=2e-3, rtol=2e-3)
    assert jnp.allclose(h_1, h_r, atol=2e-3, rtol=2e-3)
    assert jnp.allclose(c_1, c_r, atol=2e-3, rtol=2e-3)

    print("KERNEL_OK")
</pallas_src>

<mosaic_0001>
module attributes {stable_mosaic.version = 11 : i64} {
  func.func @_stacked_lstm_kernel(%arg0: i32, %arg1: memref<8x48xf32, #tpu.memory_space<vmem>>, %arg2: memref<48x128xbf16, #tpu.memory_space<vmem>>, %arg3: memref<1x160x128xbf16, #tpu.memory_space<vmem>>, %arg4: memref<1x1x128xf32, #tpu.memory_space<vmem>>, %arg5: memref<1x8x32xf32, #tpu.memory_space<vmem>>, %arg6: memref<1x8x32xf32, #tpu.memory_space<vmem>>, %arg7: memref<1x8x32xf32, #tpu.memory_space<vmem>>, %arg8: memref<1x8x32xf32, #tpu.memory_space<vmem>>, %arg9: memref<8x160xbf16, #tpu.memory_space<vmem>>, %arg10: memref<8x128xf32, #tpu.memory_space<vmem>>) attributes {dimension_semantics = [#tpu.dimension_semantics<arbitrary>], iteration_bounds = array<i64: 3>, scalar_prefetch = 0 : i64, scratch_operands = 2 : i64, tpu.core_type = #tpu.core_type<tc>, window_params = [{pipeline_mode = #tpu.pipeline_mode<synchronous>, transform_indices = @transform_0, window_bounds = array<i64: 8, 48>}, {pipeline_mode = #tpu.pipeline_mode<synchronous>, transform_indices = @transform_1, window_bounds = array<i64: 48, 128>}, {transform_indices = @transform_2, window_bounds = array<i64: 1, 160, 128>}, {transform_indices = @transform_3, window_bounds = array<i64: 1, 1, 128>}, {transform_indices = @transform_4, window_bounds = array<i64: 1, 8, 32>}, {transform_indices = @transform_5, window_bounds = array<i64: 1, 8, 32>}, {transform_indices = @transform_6, window_bounds = array<i64: 1, 8, 32>}, {transform_indices = @transform_7, window_bounds = array<i64: 1, 8, 32>}]} {
    %c0_i32 = arith.constant 0 : i32
    %0 = arith.cmpi eq, %arg0, %c0_i32 : i32
    %1 = arith.extui %0 : i1 to i32
    %c0_i32_0 = arith.constant 0 : i32
    %2 = arith.cmpi ne, %1, %c0_i32_0 : i32
    scf.if %2 {
      %cst_28 = arith.constant 0.000000e+00 : bf16
      %46 = vector.broadcast %cst_28 : bf16 to vector<8x128xbf16>
      %c0_29 = arith.constant 0 : index
      %c0_30 = arith.constant 0 : index
      %47 = vector.load %arg9[%c0_29, %c0_30] : memref<8x160xbf16, #tpu.memory_space<vmem>>, vector<8x128xbf16>
      tpu.vector_store %arg9[%c0_29, %c0_30], %46 {strides = array<i32>} : memref<8x160xbf16, #tpu.memory_space<vmem>>, vector<8x128xbf16>,
      %c0_31 = arith.constant 0 : index
      %c0_32 = arith.constant 0 : index
      %48 = vector.load %arg1[%c0_31, %c0_32] : memref<8x48xf32, #tpu.memory_space<vmem>>, vector<8x48xf32>
      %49 = arith.truncf %48 : vector<8x48xf32> to vector<8x48xbf16>
      %c0_33 = arith.constant 0 : index
      %c0_34 = arith.constant 0 : index
      %50 = vector.load %arg2[%c0_33, %c0_34] : memref<48x128xbf16, #tpu.memory_space<vmem>>, vector<48x128xbf16>
      %cst_35 = arith.constant dense<0.000000e+00> : vector<8x128xf32>
      %51 = tpu.matmul %49, %50, %cst_35 {dimension_numbers = #tpu.dot_dimension_numbers<[1], [0], [0], [1], [0, 0, 1, 1], [], []>} : vector<8x48xbf16>, vector<48x128xbf16>, vector<8x128xf32> -> vector<8x128xf32>
      %c0_36 = arith.constant 0 : index
      %c0_37 = arith.constant 0 : index
      %52 = vector.load %arg10[%c0_36, %c0_37] : memref<8x128xf32, #tpu.memory_space<vmem>>, vector<8x128xf32>
      tpu.vector_store %arg10[%c0_36, %c0_37], %51 {strides = array<i32>} : memref<8x128xf32, #tpu.memory_space<vmem>>, vector<8x128xf32>,
    } else {
    }
    %c0_i32_1 = arith.constant 0 : i32
    %3 = arith.cmpi sgt, %arg0, %c0_i32_1 : i32
    %4 = arith.extui %3 : i1 to i32
    %c0_i32_2 = arith.constant 0 : i32
    %5 = arith.cmpi ne, %4, %c0_i32_2 : i32
    scf.if %5 {
      %cst_28 = arith.constant 0.000000e+00 : f32
      %46 = vector.broadcast %cst_28 : f32 to vector<8x128xf32>
      %c0_29 = arith.constant 0 : index
      %c0_30 = arith.constant 0 : index
      %47 = vector.load %arg10[%c0_29, %c0_30] : memref<8x128xf32, #tpu.memory_space<vmem>>, vector<8x128xf32>
      tpu.vector_store %arg10[%c0_29, %c0_30], %46 {strides = array<i32>} : memref<8x128xf32, #tpu.memory_space<vmem>>, vector<8x128xf32>,
    } else {
    }
    %c0 = arith.constant 0 : index
    %c0_3 = arith.constant 0 : index
    %c0_4 = arith.constant 0 : index
    %6 = vector.load %arg5[%c0, %c0_3, %c0_4] : memref<1x8x32xf32, #tpu.memory_space<vmem>>, vector<1x8x32xf32>
    %7 = vector.shape_cast %6 : vector<1x8x32xf32> to vector<8x32xf32>
    %8 = arith.truncf %7 : vector<8x32xf32> to vector<8x32xbf16>
    %c0_5 = arith.constant 0 : index
    %c128 = arith.constant 128 : index
    %9 = vector.load %arg9[%c0_5, %c128] : memref<8x160xbf16, #tpu.memory_space<vmem>>, vector<8x32xbf16>
    tpu.vector_store %arg9[%c0_5, %c128], %8 {strides = array<i32>} : memref<8x160xbf16, #tpu.memory_space<vmem>>, vector<8x32xbf16>,
    %c0_6 = arith.constant 0 : index
    %c0_7 = arith.constant 0 : index
    %10 = vector.load %arg9[%c0_6, %c0_7] : memref<8x160xbf16, #tpu.memory_space<vmem>>, vector<8x160xbf16>
    %c0_8 = arith.constant 0 : index
    %c0_9 = arith.constant 0 : index
    %c0_10 = arith.constant 0 : index
    %11 = vector.load %arg3[%c0_8, %c0_9, %c0_10] : memref<1x160x128xbf16, #tpu.memory_space<vmem>>, vector<1x160x128xbf16>
    %12 = vector.shape_cast %11 : vector<1x160x128xbf16> to vector<160x128xbf16>
    %cst = arith.constant dense<0.000000e+00> : vector<8x128xf32>
    %13 = tpu.matmul %10, %12, %cst {dimension_numbers = #tpu.dot_dimension_numbers<[1], [0], [0], [1], [0, 0, 1, 1], [], []>} : vector<8x160xbf16>, vector<160x128xbf16>, vector<8x128xf32> -> vector<8x128xf32>
    %c0_11 = arith.constant 0 : index
    %c0_12 = arith.constant 0 : index
    %c0_13 = arith.constant 0 : index
    %14 = vector.load %arg4[%c0_11, %c0_12, %c0_13] : memref<1x1x128xf32, #tpu.memory_space<vmem>>, vector<1x1x128xf32>
    %15 = vector.shape_cast %14 : vector<1x1x128xf32> to vector<1x128xf32>
    %16 = vector.broadcast %15 : vector<1x128xf32> to vector<8x128xf32>
    %17 = arith.addf %13, %16 : vector<8x128xf32>
    %c0_14 = arith.constant 0 : index
    %c0_15 = arith.constant 0 : index
    %18 = vector.load %arg10[%c0_14, %c0_15] : memref<8x128xf32, #tpu.memory_space<vmem>>, vector<8x128xf32>
    %19 = arith.addf %17, %18 : vector<8x128xf32>
    %20 = vector.extract_strided_slice %19 {offsets = [0, 0], sizes = [8, 96], strides = [1, 1]} : vector<8x128xf32> to vector<8x96xf32>
    %21 = arith.negf %20 : vector<8x96xf32>
    %22 = math.exp %21 : vector<8x96xf32>
    %cst_16 = arith.constant 1.000000e+00 : f32
    %23 = vector.broadcast %cst_16 : f32 to vector<8x96xf32>
    %24 = arith.addf %23, %22 : vector<8x96xf32>
    %25 = arith.divf %23, %24 : vector<8x96xf32>
    %26 = vector.extract_strided_slice %25 {offsets = [0, 0], sizes = [8, 32], strides = [1, 1]} : vector<8x96xf32> to vector<8x32xf32>
    %27 = vector.extract_strided_slice %25 {offsets = [0, 32], sizes = [8, 32], strides = [1, 1]} : vector<8x96xf32> to vector<8x32xf32>
    %28 = vector.extract_strided_slice %25 {offsets = [0, 64], sizes = [8, 32], strides = [1, 1]} : vector<8x96xf32> to vector<8x32xf32>
    %29 = vector.extract_strided_slice %19 {offsets = [0, 96], sizes = [8, 32], strides = [1, 1]} : vector<8x128xf32> to vector<8x32xf32>
    %30 = math.tanh %29 : vector<8x32xf32>
    %c0_17 = arith.constant 0 : index
    %c0_18 = arith.constant 0 : index
    %c0_19 = arith.constant 0 : index
    %31 = vector.load %arg6[%c0_17, %c0_18, %c0_19] : memref<1x8x32xf32, #tpu.memory_space<vmem>>, vector<1x8x32xf32>
    %32 = vector.shape_cast %31 : vector<1x8x32xf32> to vector<8x32xf32>
    %33 = arith.mulf %27, %32 : vector<8x32xf32>
    %34 = arith.mulf %26, %30 : vector<8x32xf32>
    %35 = arith.addf %33, %34 : vector<8x32xf32>
    %36 = math.tanh %35 : vector<8x32xf32>
    %37 = arith.mulf %28, %36 : vector<8x32xf32>
    %c0_20 = arith.constant 0 : index
    %c0_21 = arith.constant 0 : index
    %c0_22 = arith.constant 0 : index
    %38 = vector.load %arg7[%c0_20, %c0_21, %c0_22] : memref<1x8x32xf32, #tpu.memory_space<vmem>>, vector<1x8x32xf32>
    %39 = vector.shape_cast %38 : vector<1x8x32xf32> to vector<8x32xf32>
    %40 = vector.shape_cast %37 : vector<8x32xf32> to vector<1x8x32xf32>
    tpu.vector_store %arg7[%c0_20, %c0_21, %c0_22], %40 {strides = array<i32>} : memref<1x8x32xf32, #tpu.memory_space<vmem>>, vector<1x8x32xf32>,
    %c0_23 = arith.constant 0 : index
    %c0_24 = arith.constant 0 : index
    %c0_25 = arith.constant 0 : index
    %41 = vector.load %arg8[%c0_23, %c0_24, %c0_25] : memref<1x8x32xf32, #tpu.memory_space<vmem>>, vector<1x8x32xf32>
    %42 = vector.shape_cast %41 : vector<1x8x32xf32> to vector<8x32xf32>
    %43 = vector.shape_cast %35 : vector<8x32xf32> to vector<1x8x32xf32>
    tpu.vector_store %arg8[%c0_23, %c0_24, %c0_25], %43 {strides = array<i32>} : memref<1x8x32xf32, #tpu.memory_space<vmem>>, vector<1x8x32xf32>,
    %44 = arith.truncf %37 : vector<8x32xf32> to vector<8x32xbf16>
    %c0_26 = arith.constant 0 : index
    %c0_27 = arith.constant 0 : index
    %45 = vector.load %arg9[%c0_26, %c0_27] : memref<8x160xbf16, #tpu.memory_space<vmem>>, vector<8x32xbf16>
    tpu.vector_store %arg9[%c0_26, %c0_27], %44 {strides = array<i32>} : memref<8x160xbf16, #tpu.memory_space<vmem>>, vector<8x32xbf16>,
    return
  }
  func.func @transform_0(%arg0: i32) -> (i32, i32) {
    %c0_i32 = arith.constant 0 : i32
    %c0_i32_0 = arith.constant 0 : i32
    %c0_i32_1 = arith.constant 0 : i32
    return %c0_i32, %c0_i32_0 : i32, i32
  }
  func.func @transform_1(%arg0: i32) -> (i32, i32) {
    %c0_i32 = arith.constant 0 : i32
    %c0_i32_0 = arith.constant 0 : i32
    %c0_i32_1 = arith.constant 0 : i32
    return %c0_i32, %c0_i32_0 : i32, i32
  }
  func.func @transform_2(%arg0: i32) -> (i32, i32, i32) {
    %c0_i32 = arith.constant 0 : i32
    %c0_i32_0 = arith.constant 0 : i32
    %c0_i32_1 = arith.constant 0 : i32
    return %arg0, %c0_i32, %c0_i32_0 : i32, i32, i32
  }
  func.func @transform_3(%arg0: i32) -> (i32, i32, i32) {
    %c0_i32 = arith.constant 0 : i32
    %c0_i32_0 = arith.constant 0 : i32
    %c0_i32_1 = arith.constant 0 : i32
    return %arg0, %c0_i32, %c0_i32_0 : i32, i32, i32
  }
  func.func @transform_4(%arg0: i32) -> (i32, i32, i32) {
    %c0_i32 = arith.constant 0 : i32
    %c0_i32_0 = arith.constant 0 : i32
    %c0_i32_1 = arith.constant 0 : i32
    return %arg0, %c0_i32, %c0_i32_0 : i32, i32, i32
  }
  func.func @transform_5(%arg0: i32) -> (i32, i32, i32) {
    %c0_i32 = arith.constant 0 : i32
    %c0_i32_0 = arith.constant 0 : i32
    %c0_i32_1 = arith.constant 0 : i32
    return %arg0, %c0_i32, %c0_i32_0 : i32, i32, i32
  }
  func.func @transform_6(%arg0: i32) -> (i32, i32, i32) {
    %c0_i32 = arith.constant 0 : i32
    %c0_i32_0 = arith.constant 0 : i32
    %c0_i32_1 = arith.constant 0 : i32
    return %arg0, %c0_i32, %c0_i32_0 : i32, i32, i32
  }
  func.func @transform_7(%arg0: i32) -> (i32, i32, i32) {
    %c0_i32 = arith.constant 0 : i32
    %c0_i32_0 = arith.constant 0 : i32
    %c0_i32_1 = arith.constant 0 : i32
    return %arg0, %c0_i32, %c0_i32_0 : i32, i32, i32
  }
}

</mosaic_0001>

<bundles_post_ra>
// kernel: stacked_lstm_forward.1
= control target key start
LH: loop header
LB: loop body
LE: loop exit
PB: predicated region body
PF: predicated region fallthrough
CT: control target
= control target key end

     0   :  { %13 = vsyncpa [#allocation5], 0  ;;  %s1184_s0 = inlined_call_operand.vmem [shape: f32[8,48], index: 0, kind: input, shape index: {}]   ;;  %s1185_s1 = inlined_call_operand.vmem [shape: bf16[48,128], index: 1, kind: input, shape index: {}]   ;;  %s1186_s2 = inlined_call_operand.hbm [shape: bf16[3,160,128], index: 2, kind: input, shape index: {}]   ;;  %s1187_s3 = inlined_call_operand.vmem [shape: f32[3,1,128], index: 3, kind: input, shape index: {}]   ;;  %s1188_s4 = inlined_call_operand.vmem [shape: f32[3,8,32], index: 4, kind: input, shape index: {}, may-alias: {4,6}]   ;;  %s1189_s5 = inlined_call_operand.vmem [shape: f32[3,8,32], index: 5, kind: input, shape index: {}, may-alias: {5,7}]   ;;  %s1190_s6 = inlined_call_operand.vmem [shape: f32[3,8,32], index: 6, kind: output, shape index: {0}, may-alias: {4,6}]   ;;  %s1191_s7 = inlined_call_operand.vmem [shape: f32[3,8,32], index: 7, kind: output, shape index: {1}, may-alias: {5,7}]  }
   0x1   :  { %15 = vsyncpa [#allocation5 + $0x1], 0  ;;  %s998_s24 = smov 0   ;;  %s1000_s25 = smov 0  }
   0x2   :  { %s1002_s26 = smov 0   ;;  %s1004_s27 = smov 0  }
   0x3 LB: > { %s1017_s28 = sadd.s32 4294967295, %s945_s27   ;;  %s1020_s29 = sadd.s32 1, %s945_s27   ;;  %s945_s27 = sphi %s1004_s27, %s1198_s27   ;;  %s941_s26 = sphi %s1002_s26, %s1197_s26   ;;  %s937_s25 = sphi %s1000_s25, %s1196_s25   ;;  %s933_s24 = sphi %s998_s24, %s1195_s24  }
   0x4   : > { %s67_s30 = ssub.s32 %s945_s27, %s1020_s29  ;;  %s70_s8 = sadd.s32 1, %s941_s26 }
   0x5   : > { %p68_p0 = scmp.eq.s32.totalorder %s67_s30, 0  ;;  %p77_p1 = scmp.ne.s32.totalorder %s941_s26, %s937_s25 }
   0x6   : > { %p78_p2 = scmp.eq.s32.totalorder %s945_s27, 0  ;;  %p83_p3 = scmp.ne.s32.totalorder %s937_s25, %s933_s24 }
   0x7   : > { %s1030_s9 = scalar_select %p68_p0, %s941_s26, %s70_s8  }
   0x8   : > { %p79_p4 = por %p78_p2, %p77_p1  ;;  %p84_p5 = scmp.eq.s32.totalorder %s1017_s28, 0 }
   0x9   : > { %p815_p6 = scmp.lt.s32.totalorder %s945_s27, 3  ;;  %s243_s11 = sand.u32 1, %s941_s26  }
   0xa   : > { %p1034_p7 = por %p84_p5, %p83_p3  ;;  %s806_s12 = smul.u32 80, %s243_s11 }
   0xb   : > { %s807_s13 = smul.u32 1280, %s945_s27  ;;  %p1040_p8 = pnand %p815_p6, %p79_p4 }
   0xc   : > { %s247_s18 = scalar_lea.vmem [#allocation4], %s806_s12  ;;  %s1052_s20 = scalar_lea.sflag [#allocation5], %s243_s11 }
   0xd   : > { %s1047_s17 = scalar_lea.hbm %s1186_s2, %s807_s13  ;;  %s254_s19 = sshll.u32 %s247_s18, 4  ;;  %s1049_s19 = int_to_ptr.vmem [resolvable:$true] %s254_s19 }
   0xe   : > { %s881_s21 = scalar_lea.hbm %s1047_s17, 1280  ;;  %p883_p11 = pneg %p1040_p8 }
   0xf   : > { %p882_p10 = scmp.ne.s32.totalorder %s1047_s17, %s881_s21  ;;  %s886_s24 = scalar_lea.hbm %s1186_s2, 3840 }
  0x10   : > { %p887_p0 = scmp.lt.u32.totalorder %s1047_s17, %s1186_s2  ;;  %p888_p1 = scmp.lt.u32.totalorder %s886_s24, %s881_s21 }
  0x11   : > { %p884_p12 = pnand %p883_p11, %p882_p10  ;;  %p890_p3 = scmp.lt.u32.totalorder %s881_s21, %s1047_s17 }
  0x12   : > { %p889_p2 = por %p888_p1, %p887_p0 }
  0x13   : > { %p885_p13 = pneg %p884_p12 }
  0x14   : > { %p891_p4 = por %p890_p3, %p889_p2 }
  0x16   : > { %p892_p5 = pnand %p891_p4, %p885_p13 }
  0x18   : > { %895 = shalt.err (!%p892_p5)
}
  0x19   : > { %s896_s11 = scalar_lea.vmem %s1049_s19, 1280  ;;  %s947_s12 = smov [#allocation4]  }
  0x1a   : > { %p897_p6 = scmp.ne.s32.totalorder %s1049_s19, %s896_s11  ;;  %s901_s13 = sshll.u32 %s947_s12, 4  ;;  %s902_s13 = int_to_ptr.vmem [resolvable:$false] %s901_s13 }
  0x1b   : > { %s903_s15 = scalar_lea.vmem %s902_s13, 2560  ;;  %p904_p9 = scmp.lt.s32.totalorder %s1049_s19, %s902_s13 }
  0x1c   : > { %p899_p10 = pnand %p897_p6, %p883_p11  ;;  %p905_p0 = scmp.lt.s32.totalorder %s903_s15, %s896_s11 }
  0x1e   : > { %p900_p12 = pneg %p899_p10  ;;  %p906_p1 = por %p905_p0, %p904_p9 }
  0x20   : > { %p907_p2 = pnand %p906_p1, %p900_p12 }
  0x22   : > { %910 = shalt.err (!%p907_p2)
}
  0x23   : > { %s948_s16 = smov 64   ;;  %s949_s18 = smov 4  }
  0x24   : > { %814 = dma.hbm_to_vmem [thread:$0]  (!%p1040_p8), %s1047_s17, 1280, %s1049_s19, %s1052_s20, %s948_s16, %s948_s16, %s949_s18  }
  0x25   : > { %p282_p11 = scmp.lt.s32.totalorder %s945_s27, 4  ;;  %p1194_p13 = scmp.ge.s32.totalorder %s945_s27, 1 }
  0x27   : > { %p283_p3 = pnand %p1194_p13, %p282_p11 }
  0x28   : > { %s288_s21 = sand.u32 (!%p283_p3), 1, %s937_s25  }
  0x29   : > { %286 = sbr.rel (%p283_p3) target bundleno = 1038 (0x40e), region = 44  ;;  %s289_s23 = scalar_lea.sflag (!%p283_p3), [#allocation5], %s288_s21 }
  0x2a   : > { %s808_s22 = smul.u32 (!%p283_p3), 80, %s288_s21 }
  0x2c   : > { %s1084_s24 = scalar_lea.vmem (!%p283_p3), [#allocation4], %s808_s22 }
  0x30   : > { %928 = dma.done.wait (%p1034_p7), %s289_s23, 1280  }
  0x31   : > { %930 = vsyncadd (%p1034_p7), %s289_s23, 4294966016  ;;  %p337_p9 = scmp.lt.s32.totalorder %s1017_s28, 2  ;;  %p767_p7 = scmp.ne.s32.totalorder %s1017_s28, 0 }
  0x32   : > { %v950_v0 = vmov (!%p767_p7), 0   ;;  %v951_v1 = vmov (!%p767_p7), 0.0   ;;  %v858_v2 = vld [vmem:[%s1185_s1] sm:$0xff] (!%p767_p7)   ;;  %vm952_vm0 = vmmov (!%p767_p7), 0   ;;  %v859_v3 = vld [vmem:[%s1185_s1 + $0x8] sm:$0xff] (!%p767_p7)   ;;  %v860_v4 = vld [vmem:[%s1185_s1 + $0x10] sm:$0xff] (!%p767_p7)  }
  0x33   : > { %s1092_s14 = scalar_select %p337_p9, %s1017_s28, 2 }
  0x34   : > { %360 = sbr.rel (%p767_p7) target bundleno = 279 (0x117), region = 52  ;;  %361 = vst [vmem:[#allocation2] sm:$0xf] (!%p767_p7), %v950_v0  ;;  %796 = vmatprep.subr.bf16.mxu0 (!%p767_p7), %v951_v1  ;;  %802 = vmatprep.mubr.msk.bf16.mxu0 (!%p767_p7), %vm952_vm0, %v951_v1  ;;  %v362_v5 = vld [vmem:[%s1184_s0] sm:$0xff] (!%p767_p7)  ;;  %vm388_vm1 = vcmask (!%p767_p7), 392192  }
  0x35   : > { %s339_s19 = scalar_lea.vmem %s1187_s3, %s1092_s14  ;;  %s1099_s20 = sshll.u32 %s1092_s14, 3  ;;  %797 = vmatpush3.bf16.msra.mxu0 (!%p767_p7), %v858_v2  ;;  %v363_v6 = vpack.c.bf16 (!%p767_p7), %v362_v5, %v362_v5 }
  0x36   : > { %s343_s10 = scalar_lea.vmem %s1188_s4, %s1099_s20  ;;  %s347_s13 = scalar_lea.vmem %s1189_s5, %s1099_s20  ;;  %798 = vmatprep.subr.bf16.mxu0 (!%p767_p7), %v951_v1 }
  0x37   : > { %s351_s18 = scalar_lea.vmem %s1190_s6, %s1099_s20  ;;  %s355_s23 = scalar_lea.vmem %s1191_s7, %s1099_s20 }
  0x39   : > { %799 = vmatpush3.bf16.msra.mxu0 (!%p767_p7), %v859_v3 }
  0x3a   : > { %800 = vmatprep.subr.bf16.mxu0 (!%p767_p7), %v951_v1 }
  0x3d   : > { %801 = vmatpush3.bf16.msra.mxu0 %v860_v4 }
  0x40   : > { %803 = vmatmul.mubr.msk.bf16.vlgmr.msra.gmra.mrb[0].mxu0 %vm388_vm1, %v363_v6 }
 0x113   : > { %v426_v7 = vpop.f32.mrb[0].mxu0 }
 0x114   : > { %432 = vst [vmem:[#allocation3] sm:$0xff] %v426_v7  ;;  %v804_v8 = vpop.f32.mrb[1].mxu0 }
 0x115   : > { %v429_v9 = vpop.f32.mrb[2].mxu0 }
 0x116   : > { %v805_v10 = vpop.f32.mrb[3].mxu0 }
 0x117 PF: > { %p772_p8 = scmp.le.s32.totalorder %s1017_s28, 0 }
 0x118   : > { %v953_v11 = vmov (!%p772_p8), 0.0  }
 0x119   : > { %436 = sbr.rel (%p772_p8) target bundleno = 288 (0x120), region = 56  ;;  %437 = vst [vmem:[#allocation3] sm:$0xff] (!%p772_p8), %v953_v11 }
 0x120 PF: > { %v861_v12 = vld [vmem:[%s1084_s24] sm:$0xff]   ;;  %v954_v13 = vmov 0   ;;  %v862_v14 = vld [vmem:[%s1084_s24 + $0x8] sm:$0xff]   ;;  %v863_v15 = vld [vmem:[%s1084_s24 + $0x10] sm:$0xff]   ;;  %vm440_vm2 = vcmask 257024   ;;  %vm536_vm3 = vcmask 261120  }
 0x121   : > { %540 = vmatprep.subr.bf16.mxu0 %v954_v13  ;;  %v864_v16 = vld [vmem:[%s1084_s24 + $0x18] sm:$0xff]   ;;  %v438_v17 = vld [vmem:[%s343_s10] sm:$0xff]  ;;  %v866_v20 = vld [vmem:[%s1084_s24 + $0x28] sm:$0xff]   ;;  %s956_s14 = smov 96  }
 0x122   : > { %541 = vmatpush1.bf16.msra.mxu0 %v861_v12  ;;  %v439_v18 = vpack.c.bf16 %v438_v17, %v438_v17  ;;  %v865_v19 = vld [vmem:[%s1084_s24 + $0x20] sm:$0xff]   ;;  %v867_v23 = vld [vmem:[%s1084_s24 + $0x30] sm:$0xff]   ;;  %v868_v24 = vld [vmem:[%s1084_s24 + $0x38] sm:$0xff]  }
 0x123   : > { %542 = vmatprep.subr.bf16.mxu0 %v954_v13  ;;  %v869_v25 = vld [vmem:[%s1084_s24 + $0x40] sm:$0xff]   ;;  %v870_v26 = vld [vmem:[%s1084_s24 + $0x48] sm:$0xff]   ;;  %s955_s24 = smov 32  }
 0x124   : > { %441 = vst.msk [vmem:[#allocation2 + $0x4] sm:$0xf] %vm440_vm2, %v439_v18  ;;  %v773_v28 = vld [vmem:[%s339_s19] ss:$0 sm:$0xff]  ;;  %v580_v30 = vld [vmem:[#allocation3] sm:$0xff]  ;;  %s957_s19 = smov 64  }
 0x125   : > { %v589_v37 = vld [vmem:[%s347_s13] sm:$0xff] }
 0x126   : > { %543 = vmatpush1.bf16.msra.mxu0 %v862_v14 }
 0x127   : > { %544 = vmatprep.subr.bf16.mxu0 %v954_v13 }
 0x12a   : > { %545 = vmatpush1.bf16.msra.mxu0 %v863_v15 }
 0x12b   : > { %546 = vmatprep.subr.bf16.mxu0 %v954_v13  ;;  %v442_v21 = vld [vmem:[#allocation2] sm:$0xff] }
 0x12c   : > { %v775_v22 = vcombine.high %v442_v21, %v442_v21  ;;  %v774_v27 = vcombine.low %v442_v21, %v442_v21 }
 0x12e   : > { %547 = vmatpush1.bf16.msra.mxu0 %v864_v16  ;;  %786 = vmatprep.mubr.msk.bf16.mxu0 %vm536_vm3, %v775_v22 }
 0x12f   : > { %548 = vmatprep.subr.bf16.mxu0 %v954_v13 }
 0x132   : > { %549 = vmatpush1.bf16.msra.mxu0 %v865_v19 }
 0x133   : > { %550 = vmatprep.subr.bf16.mxu0 %v954_v13 }
 0x136   : > { %551 = vmatpush1.bf16.msra.mxu0 %v866_v20 }
 0x137   : > { %552 = vmatprep.subr.bf16.mxu0 %v954_v13 }
 0x13a   : > { %553 = vmatpush1.bf16.msra.mxu0 %v867_v23 }
 0x13b   : > { %554 = vmatprep.subr.bf16.mxu0 %v954_v13 }
 0x13e   : > { %555 = vmatpush1.bf16.msra.mxu0 %v868_v24 }
 0x13f   : > { %556 = vmatprep.subr.bf16.mxu0 %v954_v13 }
 0x142   : > { %557 = vmatpush1.bf16.msra.mxu0 %v869_v25 }
 0x143   : > { %558 = vmatprep.subr.bf16.mxu0 %v954_v13 }
 0x146   : > { %559 = vmatpush1.bf16.msra.mxu0 %v870_v26 }
 0x149   : > { %573 = vmatmul.mubr.bf16.vlgmr.msra.gmra.mrb[0].mxu0 %v774_v27 }
 0x21c   : > { %v574_v29 = vpop.f32.mrb[0].mxu0 }
 0x21d   : > { %v575_v31 = vadd.f32 %v773_v28, %v574_v29  ;;  %v576_v32 = vpop.f32.mrb[1].mxu0 }
 0x21e   : > { %v577_v33 = vpop.f32.mrb[2].mxu0 }
 0x21f   : > { %v581_v34 = vadd.f32 %v580_v30, %v575_v31  ;;  %v578_v35 = vpop.f32.mrb[3].mxu0 }
 0x221   : > { %873 = vtanh.f32 %v581_v34  ;;  %v787_v38 = vmul.f32 -1.442695, %v581_v34 }
 0x223   : > { %875 = vpow2.f32 %v787_v38 }
 0x22b   : > { %v874_v36 = vpop.eup %873 }
 0x22c   : > { %596 = vrot.lane.b32.xlu0 %v874_v36, %s955_s24 }
 0x22d   : > { %v876_v39 = vpop.eup %875 }
 0x22e   : > { %v585_v40 = vadd.f32 1.0, %v876_v39 }
 0x230   : > { %591 = vrot.lane.b32.xlu0 %v589_v37, %s955_s24  ;;  %877 = vrcp.f32 %v585_v40 }
 0x23a   : > { %v878_v41 = vpop.eup %877 }
 0x29e   : > { %v597_v42 = vpop.permute.xlu0 %596 }
 0x29f   : > { %v599_v43 = vmul.f32 %v878_v41, %v597_v42 }
 0x2a1   : > { %601 = vrot.lane.b32.xlu1 %v599_v43, %s955_s24 }
 0x2a2   : > { %v592_v44 = vpop.permute.xlu0 %591 }
 0x2a3   : > { %v594_v45 = vmul.f32 %v878_v41, %v592_v44 }
 0x313   : > { %v602_v46 = vpop.permute.xlu1 %601 }
 0x314   : > { %v604_v47 = vadd.f32 %v602_v46, %v594_v45 }
 0x316   : > { %879 = vtanh.f32 %v604_v47 }
 0x320   : > { %v880_v48 = vpop.eup %879 }
 0x321   : > { %607 = vrot.lane.b32.xlu1 %v880_v48, %s955_s24 }
 0x325   : > { %617 = vrot.lane.b32.xlu1 %v604_v47, %s956_s14 }
 0x393   : > { %v608_v49 = vpop.permute.xlu1 %607 }
 0x394   : > { %v610_v50 = vmul.f32 %v878_v41, %v608_v49 }
 0x396   : > { %612 = vrot.lane.b32.xlu0 %v610_v50, %s957_s19  ;;  %v791_v52 = vpack.c.bf16 %v610_v50, %v610_v50 }
 0x397   : > { %v618_v51 = vpop.permute.xlu1 %617 }
 0x398   : > { %620 = vst.msk [vmem:[%s355_s23] sm:$0xff] %vm536_vm3, %v618_v51 }
 0x39a   : > { %625 = vrot.lane.b32.xlu0 %v791_v52, %s957_s19 }
 0x408   : > { %v613_v53 = vpop.permute.xlu0 %612 }
 0x409   : > { %615 = vst.msk [vmem:[%s351_s18] sm:$0xff] %vm536_vm3, %v613_v53 }
 0x40c   : > { %v626_v54 = vpop.permute.xlu0 %625 }
 0x40d   : > { %628 = vst.msk [vmem:[#allocation2] sm:$0xf] %vm440_vm2, %v626_v54 }
 0x40e PF: > { %p18_p4 = scmp.ge.s32.totalorder %s1020_s29, 5   ;;  %s1195_s24 = smov %s937_s25 }
 0x40f   : > { %s1196_s25 = smov %s941_s26  ;;  %s1197_s26 = smov %s1030_s9 }
 0x410   : > { %s1198_s27 = smov %s1020_s29  ;;  %20 = sbr.rel (!%p18_p4) target bundleno = 3 (0x3), region = 113 }
 0x417   :  { %662 = vsyncpa [#allocation5], 1 }
 0x418   :  { %664 = vsyncpa [#allocation5 + $0x1], 1 }

</bundles_post_ra>
